<compile_context>
chip_gen: v6e
topology: v6e:2x2x1
jax: 0.10.0
libtpu: 0.0.40
codegen_flags: <defaults>
</compile_context>

<pallas_src>
import functools

import jax
import jax.numpy as jnp
import numpy as np
from jax.experimental import pallas as pl
from jax.experimental.pallas import tpu as pltpu

# ---- small, module-consistent hyperparameters ----
B = 2          # batch
T = 8          # sequence length (<= block_size)
N_EMBD = 32    # embedding dim (C)
N_HEAD = 4     # number of heads
HEAD_SIZE = N_EMBD // N_HEAD


def _mha_kernel(x_ref, wqkv_ref, wp_ref, bp_ref, o_ref, *, batch):
    """Whole problem in one invocation (no grid).

    x_ref    : (B*T, C)      bf16
    wqkv_ref : (C, 3*H*D)    bf16, C**-0.5 already folded into the q columns
    wp_ref   : (H, D, C)     bf16 (output projection, split per head)
    bp_ref   : (1, C)        f32  (output projection bias)
    o_ref    : (B*T, C)      f32
    """
    M, C = x_ref.shape
    H, D, _ = wp_ref.shape
    Tq = M // batch
    HD = H * D

    # One fused QKV matmul for every head: (B*T, C) @ (C, 3*H*D) -> f32.
    qkv = jnp.dot(x_ref[...], wqkv_ref[...],
                  preferred_element_type=jnp.float32)            # (M, 3HD)

    # Cast to bf16 MXU operands ONCE (not per head).  The (B*T, .) -> (B, T, .)
    # reshape is tile-aligned (T == 8 == f32 sublane count) and cheap.
    q_all = qkv[:, :HD].astype(jnp.bfloat16).reshape(batch, Tq, HD)
    k_all = qkv[:, HD:2 * HD].astype(jnp.bfloat16).reshape(batch, Tq, HD)
    v_all = qkv[:, 2 * HD:].astype(jnp.bfloat16).reshape(batch, Tq, HD)

    # Causal (tril) mask, shared across batch and heads.
    row = jax.lax.broadcasted_iota(jnp.int32, (Tq, Tq), 0)
    col = jax.lax.broadcasted_iota(jnp.int32, (Tq, Tq), 1)
    causal = (col <= row)[None]                                  # (1, T, T)

    acc = jnp.zeros((M, C), dtype=jnp.float32)                   # proj accumulator
    # H is a handful -> static unroll is fine (bounded vreg pressure at D=8).
    for h in range(H):
        q = q_all[:, :, h * D:(h + 1) * D]                       # (B, T, D) bf16
        k = k_all[:, :, h * D:(h + 1) * D]
        v = v_all[:, :, h * D:(h + 1) * D]

        # Scores batched over B on the MXU (scale already folded into weights).
        s = jnp.einsum('bqd,bkd->bqk', q, k,
                       preferred_element_type=jnp.float32)       # (B, T, T) f32
        s = jnp.where(causal, s, -jnp.inf)   # diagonal always kept -> no NaN row
        s = s - jnp.max(s, axis=-1, keepdims=True)
        p = jnp.exp(s)
        p = p * pl.reciprocal(jnp.sum(p, axis=-1, keepdims=True), approx=True)
        # attention dropout(p) == identity in eval mode

        out_h = jnp.einsum('bqk,bkd->bqd', p.astype(jnp.bfloat16), v,
                           preferred_element_type=jnp.float32)   # (B, T, D) f32

        # Accumulate out_h @ Wp[h] -- replaces concat + one big matmul.
        acc = acc + jnp.dot(out_h.reshape(M, D).astype(jnp.bfloat16), wp_ref[h],
                            preferred_element_type=jnp.float32)  # (M, C)

    y = acc + bp_ref[...]                                        # (1, C) broadcast
    # output dropout(y) == identity in eval mode
    o_ref[...] = y.astype(o_ref.dtype)


def pack_params(wq, wk, wv, wp, bp):
    """ONE-TIME (init-path) parameter packing.

    wq/wk/wv: (H, C, D) -> single fused (C, 3*H*D) bf16 matrix with the v2.py
    attention scale (C**-0.5, i.e. n_embd, not head_size) folded into the q
    columns.  wp: (C, C) -> per-head split (H, D, C) bf16.  bp stays f32 (1, C).
    """
    H, C, D = wq.shape
    scale = C ** -0.5

    def pack(w):                                   # (H, C, D) -> (C, H*D)
        return jnp.transpose(w, (1, 0, 2)).reshape(C, H * D)

    wqkv = jnp.concatenate([pack(wq) * scale, pack(wk), pack(wv)], axis=1)
    return (wqkv.astype(jnp.bfloat16),
            wp.reshape(H, D, C).astype(jnp.bfloat16),
            bp.astype(jnp.float32))


@jax.jit
def multi_head_attention(x, wqkv, wp_split, bp):
    """x: (B, T, C); wqkv: (C, 3*H*D) bf16; wp_split: (H, D, C) bf16; bp: (1, C)."""
    Bb, Tt, Cc = x.shape
    H, D, _ = wp_split.shape

    x_flat = x.reshape(Bb * Tt, Cc).astype(jnp.bfloat16)   # fold B into matmul M dim

    y = pl.pallas_call(
        functools.partial(_mha_kernel, batch=Bb),
        out_shape=jax.ShapeDtypeStruct((Bb * Tt, Cc), jnp.float32),
        # No grid: single invocation, whole (tiny) operands resident in VMEM.
        in_specs=[
            pl.BlockSpec(memory_space=pltpu.MemorySpace.VMEM),   # x (B*T, C)
            pl.BlockSpec(memory_space=pltpu.MemorySpace.VMEM),   # fused Wqkv
            pl.BlockSpec(memory_space=pltpu.MemorySpace.VMEM),   # Wp split per head
            pl.BlockSpec(memory_space=pltpu.MemorySpace.VMEM),   # proj bias
        ],
        out_specs=pl.BlockSpec(memory_space=pltpu.MemorySpace.VMEM),
    )(x_flat, wqkv, wp_split, bp)

    return y.reshape(Bb, Tt, Cc)


def _reference(x, wq, wk, wv, wp, bp):
    """Pure-JAX f32 reference replicating the PyTorch forward (eval mode)."""
    Bb, Tt, Cc = x.shape
    outs = []
    causal = jnp.tril(jnp.ones((Tt, Tt), dtype=bool))
    for h in range(wq.shape[0]):
        q = x @ wq[h]
        k = x @ wk[h]
        v = x @ wv[h]
        wei = (q @ jnp.swapaxes(k, -1, -2)) * (Cc ** -0.5)
        wei = jnp.where(causal[None], wei, -jnp.inf)
        wei = jax.nn.softmax(wei, axis=-1)
        outs.append(wei @ v)
    out = jnp.concatenate(outs, axis=-1)
    return out @ wp + bp[0]


if __name__ == "__main__":
    key = jax.random.PRNGKey(0)
    kx, kq, kk, kv, kp, kb = jax.random.split(key, 6)

    x = jax.random.normal(kx, (B, T, N_EMBD), dtype=jnp.float32)
    # Deterministic synthetic parameters (equivalent to nn.Linear weights,
    # stored already-transposed as (in, out) so the kernel does x @ W).
    wq = jax.random.normal(kq, (N_HEAD, N_EMBD, HEAD_SIZE), dtype=jnp.float32) * 0.1
    wk = jax.random.normal(kk, (N_HEAD, N_EMBD, HEAD_SIZE), dtype=jnp.float32) * 0.1
    wv = jax.random.normal(kv, (N_HEAD, N_EMBD, HEAD_SIZE), dtype=jnp.float32) * 0.1
    wp = jax.random.normal(kp, (N_EMBD, N_EMBD), dtype=jnp.float32) * 0.1
    bp = jax.random.normal(kb, (1, N_EMBD), dtype=jnp.float32) * 0.1

    # Init-time packing (hoisted out of the per-call path).
    wqkv_p, wp_p, bp_p = pack_params(wq, wk, wv, wp, bp)
    wqkv_p, wp_p, bp_p = jax.block_until_ready((wqkv_p, wp_p, bp_p))

    y = multi_head_attention(x, wqkv_p, wp_p, bp_p)
    jax.block_until_ready(y)

    y_ref = _reference(x, wq, wk, wv, wp, bp)
    # Tolerance accounts for bf16 MXU operands + approx reciprocal (f32 accumulation).
    np.testing.assert_allclose(np.asarray(y), np.asarray(y_ref),
                               rtol=2e-2, atol=2e-2)
    print("KERNEL_OK")
</pallas_src>

<mosaic_0001>
module attributes {stable_mosaic.version = 11 : i64} {
  func.func @_mha_kernel(%arg0: memref<16x32xbf16, #tpu.memory_space<vmem>>, %arg1: memref<32x96xbf16, #tpu.memory_space<vmem>>, %arg2: memref<4x8x32xbf16, #tpu.memory_space<vmem>>, %arg3: memref<1x32xf32, #tpu.memory_space<vmem>>, %arg4: memref<16x32xf32, #tpu.memory_space<vmem>>) attributes {dimension_semantics = [], scalar_prefetch = 0 : i64, scratch_operands = 0 : i64, tpu.core_type = #tpu.core_type<tc>} {
    %c0 = arith.constant 0 : index
    %c0_0 = arith.constant 0 : index
    %0 = vector.load %arg0[%c0, %c0_0] : memref<16x32xbf16, #tpu.memory_space<vmem>>, vector<16x32xbf16>
    %c0_1 = arith.constant 0 : index
    %c0_2 = arith.constant 0 : index
    %1 = vector.load %arg1[%c0_1, %c0_2] : memref<32x96xbf16, #tpu.memory_space<vmem>>, vector<32x96xbf16>
    %cst = arith.constant dense<0.000000e+00> : vector<16x96xf32>
    %2 = tpu.matmul %0, %1, %cst {dimension_numbers = #tpu.dot_dimension_numbers<[1], [0], [0], [1], [0, 0, 1, 1], [], []>} : vector<16x32xbf16>, vector<32x96xbf16>, vector<16x96xf32> -> vector<16x96xf32>
    %3 = vector.extract_strided_slice %2 {offsets = [0, 0], sizes = [16, 32], strides = [1, 1]} : vector<16x96xf32> to vector<16x32xf32>
    %4 = arith.truncf %3 : vector<16x32xf32> to vector<16x32xbf16>
    %5 = vector.shape_cast %4 : vector<16x32xbf16> to vector<2x8x32xbf16>
    %6 = vector.extract_strided_slice %2 {offsets = [0, 32], sizes = [16, 32], strides = [1, 1]} : vector<16x96xf32> to vector<16x32xf32>
    %7 = arith.truncf %6 : vector<16x32xf32> to vector<16x32xbf16>
    %8 = vector.shape_cast %7 : vector<16x32xbf16> to vector<2x8x32xbf16>
    %9 = vector.extract_strided_slice %2 {offsets = [0, 64], sizes = [16, 32], strides = [1, 1]} : vector<16x96xf32> to vector<16x32xf32>
    %10 = arith.truncf %9 : vector<16x32xf32> to vector<16x32xbf16>
    %11 = vector.shape_cast %10 : vector<16x32xbf16> to vector<2x8x32xbf16>
    %12 = tpu.iota {dimensions = array<i32: 0>} : vector<8x8xi32>
    %13 = tpu.iota {dimensions = array<i32: 1>} : vector<8x8xi32>
    %14 = arith.cmpi sle, %13, %12 : vector<8x8xi32>
    %15 = vector.shape_cast %14 : vector<8x8xi1> to vector<1x8x8xi1>
    %cst_3 = arith.constant 0.000000e+00 : f32
    %16 = vector.broadcast %cst_3 : f32 to vector<16x32xf32>
    %17 = vector.extract_strided_slice %5 {offsets = [0, 0, 0], sizes = [2, 8, 8], strides = [1, 1, 1]} : vector<2x8x32xbf16> to vector<2x8x8xbf16>
    %18 = vector.extract_strided_slice %8 {offsets = [0, 0, 0], sizes = [2, 8, 8], strides = [1, 1, 1]} : vector<2x8x32xbf16> to vector<2x8x8xbf16>
    %19 = vector.extract_strided_slice %11 {offsets = [0, 0, 0], sizes = [2, 8, 8], strides = [1, 1, 1]} : vector<2x8x32xbf16> to vector<2x8x8xbf16>
    "tpu.trace_start"() <{level = 10 : i32, message = "bqd,bkd->bqk"}> : () -> ()
    %cst_4 = arith.constant dense<0.000000e+00> : vector<2x8x8xf32>
    %20 = tpu.matmul %17, %18, %cst_4 {dimension_numbers = #tpu.dot_dimension_numbers<[2], [2], [1], [1], [0, 0, 0, 1, 1, 1], [0], [0]>} : vector<2x8x8xbf16>, vector<2x8x8xbf16>, vector<2x8x8xf32> -> vector<2x8x8xf32>
    %cst_5 = arith.constant 0xFF800000 : f32
    "tpu.trace_stop"() : () -> ()
    %21 = vector.shape_cast %15 : vector<1x8x8xi1> to vector<1x8x8xi1>
    %22 = vector.broadcast %21 : vector<1x8x8xi1> to vector<2x8x8xi1>
    %23 = vector.broadcast %cst_5 : f32 to vector<2x8x8xf32>
    %24 = arith.select %22, %20, %23 : vector<2x8x8xi1>, vector<2x8x8xf32>
    %cst_6 = arith.constant dense<0xFF800000> : vector<2x8xf32>
    %25 = vector.multi_reduction <maximumf>, %24, %cst_6 [2] : vector<2x8x8xf32> to vector<2x8xf32>
    %26 = vector.shape_cast %25 : vector<2x8xf32> to vector<2x8x1xf32>
    %27 = vector.broadcast %26 : vector<2x8x1xf32> to vector<2x8x8xf32>
    %28 = arith.subf %24, %27 : vector<2x8x8xf32>
    %29 = math.exp %28 : vector<2x8x8xf32>
    %cst_7 = arith.constant dense<0.000000e+00> : vector<2x8xf32>
    %30 = vector.multi_reduction <add>, %29, %cst_7 [2] : vector<2x8x8xf32> to vector<2x8xf32>
    %31 = vector.shape_cast %30 : vector<2x8xf32> to vector<2x8x1xf32>
    %32 = tpu.reciprocal %31 {approx = true} : vector<2x8x1xf32> -> vector<2x8x1xf32>
    %33 = vector.broadcast %32 : vector<2x8x1xf32> to vector<2x8x8xf32>
    %34 = arith.mulf %29, %33 : vector<2x8x8xf32>
    %35 = arith.truncf %34 : vector<2x8x8xf32> to vector<2x8x8xbf16>
    "tpu.trace_start"() <{level = 10 : i32, message = "bqk,bkd->bqd"}> : () -> ()
    %cst_8 = arith.constant dense<0.000000e+00> : vector<2x8x8xf32>
    %36 = tpu.matmul %35, %19, %cst_8 {dimension_numbers = #tpu.dot_dimension_numbers<[2], [1], [1], [2], [0, 0, 0, 1, 1, 2], [0], [0]>} : vector<2x8x8xbf16>, vector<2x8x8xbf16>, vector<2x8x8xf32> -> vector<2x8x8xf32>
    "tpu.trace_stop"() : () -> ()
    %37 = vector.shape_cast %36 : vector<2x8x8xf32> to vector<16x8xf32>
    %38 = arith.truncf %37 : vector<16x8xf32> to vector<16x8xbf16>
    %c0_9 = arith.constant 0 : index
    %c0_10 = arith.constant 0 : index
    %c0_11 = arith.constant 0 : index
    %39 = vector.load %arg2[%c0_9, %c0_10, %c0_11] : memref<4x8x32xbf16, #tpu.memory_space<vmem>>, vector<1x8x32xbf16>
    %40 = vector.shape_cast %39 : vector<1x8x32xbf16> to vector<8x32xbf16>
    %cst_12 = arith.constant dense<0.000000e+00> : vector<16x32xf32>
    %41 = tpu.matmul %38, %40, %cst_12 {dimension_numbers = #tpu.dot_dimension_numbers<[1], [0], [0], [1], [0, 0, 1, 1], [], []>} : vector<16x8xbf16>, vector<8x32xbf16>, vector<16x32xf32> -> vector<16x32xf32>
    %42 = arith.addf %16, %41 : vector<16x32xf32>
    %43 = vector.extract_strided_slice %5 {offsets = [0, 0, 8], sizes = [2, 8, 8], strides = [1, 1, 1]} : vector<2x8x32xbf16> to vector<2x8x8xbf16>
    %44 = vector.extract_strided_slice %8 {offsets = [0, 0, 8], sizes = [2, 8, 8], strides = [1, 1, 1]} : vector<2x8x32xbf16> to vector<2x8x8xbf16>
    %45 = vector.extract_strided_slice %11 {offsets = [0, 0, 8], sizes = [2, 8, 8], strides = [1, 1, 1]} : vector<2x8x32xbf16> to vector<2x8x8xbf16>
    "tpu.trace_start"() <{level = 10 : i32, message = "bqd,bkd->bqk"}> : () -> ()
    %cst_13 = arith.constant dense<0.000000e+00> : vector<2x8x8xf32>
    %46 = tpu.matmul %43, %44, %cst_13 {dimension_numbers = #tpu.dot_dimension_numbers<[2], [2], [1], [1], [0, 0, 0, 1, 1, 1], [0], [0]>} : vector<2x8x8xbf16>, vector<2x8x8xbf16>, vector<2x8x8xf32> -> vector<2x8x8xf32>
    %cst_14 = arith.constant 0xFF800000 : f32
    "tpu.trace_stop"() : () -> ()
    %47 = vector.shape_cast %15 : vector<1x8x8xi1> to vector<1x8x8xi1>
    %48 = vector.broadcast %47 : vector<1x8x8xi1> to vector<2x8x8xi1>
    %49 = vector.broadcast %cst_14 : f32 to vector<2x8x8xf32>
    %50 = arith.select %48, %46, %49 : vector<2x8x8xi1>, vector<2x8x8xf32>
    %cst_15 = arith.constant dense<0xFF800000> : vector<2x8xf32>
    %51 = vector.multi_reduction <maximumf>, %50, %cst_15 [2] : vector<2x8x8xf32> to vector<2x8xf32>
    %52 = vector.shape_cast %51 : vector<2x8xf32> to vector<2x8x1xf32>
    %53 = vector.broadcast %52 : vector<2x8x1xf32> to vector<2x8x8xf32>
    %54 = arith.subf %50, %53 : vector<2x8x8xf32>
    %55 = math.exp %54 : vector<2x8x8xf32>
    %cst_16 = arith.constant dense<0.000000e+00> : vector<2x8xf32>
    %56 = vector.multi_reduction <add>, %55, %cst_16 [2] : vector<2x8x8xf32> to vector<2x8xf32>
    %57 = vector.shape_cast %56 : vector<2x8xf32> to vector<2x8x1xf32>
    %58 = tpu.reciprocal %57 {approx = true} : vector<2x8x1xf32> -> vector<2x8x1xf32>
    %59 = vector.broadcast %58 : vector<2x8x1xf32> to vector<2x8x8xf32>
    %60 = arith.mulf %55, %59 : vector<2x8x8xf32>
    %61 = arith.truncf %60 : vector<2x8x8xf32> to vector<2x8x8xbf16>
    "tpu.trace_start"() <{level = 10 : i32, message = "bqk,bkd->bqd"}> : () -> ()
    %cst_17 = arith.constant dense<0.000000e+00> : vector<2x8x8xf32>
    %62 = tpu.matmul %61, %45, %cst_17 {dimension_numbers = #tpu.dot_dimension_numbers<[2], [1], [1], [2], [0, 0, 0, 1, 1, 2], [0], [0]>} : vector<2x8x8xbf16>, vector<2x8x8xbf16>, vector<2x8x8xf32> -> vector<2x8x8xf32>
    "tpu.trace_stop"() : () -> ()
    %63 = vector.shape_cast %62 : vector<2x8x8xf32> to vector<16x8xf32>
    %64 = arith.truncf %63 : vector<16x8xf32> to vector<16x8xbf16>
    %c1 = arith.constant 1 : index
    %c0_18 = arith.constant 0 : index
    %c0_19 = arith.constant 0 : index
    %65 = vector.load %arg2[%c1, %c0_18, %c0_19] : memref<4x8x32xbf16, #tpu.memory_space<vmem>>, vector<1x8x32xbf16>
    %66 = vector.shape_cast %65 : vector<1x8x32xbf16> to vector<8x32xbf16>
    %cst_20 = arith.constant dense<0.000000e+00> : vector<16x32xf32>
    %67 = tpu.matmul %64, %66, %cst_20 {dimension_numbers = #tpu.dot_dimension_numbers<[1], [0], [0], [1], [0, 0, 1, 1], [], []>} : vector<16x8xbf16>, vector<8x32xbf16>, vector<16x32xf32> -> vector<16x32xf32>
    %68 = arith.addf %42, %67 : vector<16x32xf32>
    %69 = vector.extract_strided_slice %5 {offsets = [0, 0, 16], sizes = [2, 8, 8], strides = [1, 1, 1]} : vector<2x8x32xbf16> to vector<2x8x8xbf16>
    %70 = vector.extract_strided_slice %8 {offsets = [0, 0, 16], sizes = [2, 8, 8], strides = [1, 1, 1]} : vector<2x8x32xbf16> to vector<2x8x8xbf16>
    %71 = vector.extract_strided_slice %11 {offsets = [0, 0, 16], sizes = [2, 8, 8], strides = [1, 1, 1]} : vector<2x8x32xbf16> to vector<2x8x8xbf16>
    "tpu.trace_start"() <{level = 10 : i32, message = "bqd,bkd->bqk"}> : () -> ()
    %cst_21 = arith.constant dense<0.000000e+00> : vector<2x8x8xf32>
    %72 = tpu.matmul %69, %70, %cst_21 {dimension_numbers = #tpu.dot_dimension_numbers<[2], [2], [1], [1], [0, 0, 0, 1, 1, 1], [0], [0]>} : vector<2x8x8xbf16>, vector<2x8x8xbf16>, vector<2x8x8xf32> -> vector<2x8x8xf32>
    %cst_22 = arith.constant 0xFF800000 : f32
    "tpu.trace_stop"() : () -> ()
    %73 = vector.shape_cast %15 : vector<1x8x8xi1> to vector<1x8x8xi1>
    %74 = vector.broadcast %73 : vector<1x8x8xi1> to vector<2x8x8xi1>
    %75 = vector.broadcast %cst_22 : f32 to vector<2x8x8xf32>
    %76 = arith.select %74, %72, %75 : vector<2x8x8xi1>, vector<2x8x8xf32>
    %cst_23 = arith.constant dense<0xFF800000> : vector<2x8xf32>
    %77 = vector.multi_reduction <maximumf>, %76, %cst_23 [2] : vector<2x8x8xf32> to vector<2x8xf32>
    %78 = vector.shape_cast %77 : vector<2x8xf32> to vector<2x8x1xf32>
    %79 = vector.broadcast %78 : vector<2x8x1xf32> to vector<2x8x8xf32>
    %80 = arith.subf %76, %79 : vector<2x8x8xf32>
    %81 = math.exp %80 : vector<2x8x8xf32>
    %cst_24 = arith.constant dense<0.000000e+00> : vector<2x8xf32>
    %82 = vector.multi_reduction <add>, %81, %cst_24 [2] : vector<2x8x8xf32> to vector<2x8xf32>
    %83 = vector.shape_cast %82 : vector<2x8xf32> to vector<2x8x1xf32>
    %84 = tpu.reciprocal %83 {approx = true} : vector<2x8x1xf32> -> vector<2x8x1xf32>
    %85 = vector.broadcast %84 : vector<2x8x1xf32> to vector<2x8x8xf32>
    %86 = arith.mulf %81, %85 : vector<2x8x8xf32>
    %87 = arith.truncf %86 : vector<2x8x8xf32> to vector<2x8x8xbf16>
    "tpu.trace_start"() <{level = 10 : i32, message = "bqk,bkd->bqd"}> : () -> ()
    %cst_25 = arith.constant dense<0.000000e+00> : vector<2x8x8xf32>
    %88 = tpu.matmul %87, %71, %cst_25 {dimension_numbers = #tpu.dot_dimension_numbers<[2], [1], [1], [2], [0, 0, 0, 1, 1, 2], [0], [0]>} : vector<2x8x8xbf16>, vector<2x8x8xbf16>, vector<2x8x8xf32> -> vector<2x8x8xf32>
    "tpu.trace_stop"() : () -> ()
    %89 = vector.shape_cast %88 : vector<2x8x8xf32> to vector<16x8xf32>
    %90 = arith.truncf %89 : vector<16x8xf32> to vector<16x8xbf16>
    %c2 = arith.constant 2 : index
    %c0_26 = arith.constant 0 : index
    %c0_27 = arith.constant 0 : index
    %91 = vector.load %arg2[%c2, %c0_26, %c0_27] : memref<4x8x32xbf16, #tpu.memory_space<vmem>>, vector<1x8x32xbf16>
    %92 = vector.shape_cast %91 : vector<1x8x32xbf16> to vector<8x32xbf16>
    %cst_28 = arith.constant dense<0.000000e+00> : vector<16x32xf32>
    %93 = tpu.matmul %90, %92, %cst_28 {dimension_numbers = #tpu.dot_dimension_numbers<[1], [0], [0], [1], [0, 0, 1, 1], [], []>} : vector<16x8xbf16>, vector<8x32xbf16>, vector<16x32xf32> -> vector<16x32xf32>
    %94 = arith.addf %68, %93 : vector<16x32xf32>
    %95 = vector.extract_strided_slice %5 {offsets = [0, 0, 24], sizes = [2, 8, 8], strides = [1, 1, 1]} : vector<2x8x32xbf16> to vector<2x8x8xbf16>
    %96 = vector.extract_strided_slice %8 {offsets = [0, 0, 24], sizes = [2, 8, 8], strides = [1, 1, 1]} : vector<2x8x32xbf16> to vector<2x8x8xbf16>
    %97 = vector.extract_strided_slice %11 {offsets = [0, 0, 24], sizes = [2, 8, 8], strides = [1, 1, 1]} : vector<2x8x32xbf16> to vector<2x8x8xbf16>
    "tpu.trace_start"() <{level = 10 : i32, message = "bqd,bkd->bqk"}> : () -> ()
    %cst_29 = arith.constant dense<0.000000e+00> : vector<2x8x8xf32>
    %98 = tpu.matmul %95, %96, %cst_29 {dimension_numbers = #tpu.dot_dimension_numbers<[2], [2], [1], [1], [0, 0, 0, 1, 1, 1], [0], [0]>} : vector<2x8x8xbf16>, vector<2x8x8xbf16>, vector<2x8x8xf32> -> vector<2x8x8xf32>
    %cst_30 = arith.constant 0xFF800000 : f32
    "tpu.trace_stop"() : () -> ()
    %99 = vector.shape_cast %15 : vector<1x8x8xi1> to vector<1x8x8xi1>
    %100 = vector.broadcast %99 : vector<1x8x8xi1> to vector<2x8x8xi1>
    %101 = vector.broadcast %cst_30 : f32 to vector<2x8x8xf32>
    %102 = arith.select %100, %98, %101 : vector<2x8x8xi1>, vector<2x8x8xf32>
    %cst_31 = arith.constant dense<0xFF800000> : vector<2x8xf32>
    %103 = vector.multi_reduction <maximumf>, %102, %cst_31 [2] : vector<2x8x8xf32> to vector<2x8xf32>
    %104 = vector.shape_cast %103 : vector<2x8xf32> to vector<2x8x1xf32>
    %105 = vector.broadcast %104 : vector<2x8x1xf32> to vector<2x8x8xf32>
    %106 = arith.subf %102, %105 : vector<2x8x8xf32>
    %107 = math.exp %106 : vector<2x8x8xf32>
    %cst_32 = arith.constant dense<0.000000e+00> : vector<2x8xf32>
    %108 = vector.multi_reduction <add>, %107, %cst_32 [2] : vector<2x8x8xf32> to vector<2x8xf32>
    %109 = vector.shape_cast %108 : vector<2x8xf32> to vector<2x8x1xf32>
    %110 = tpu.reciprocal %109 {approx = true} : vector<2x8x1xf32> -> vector<2x8x1xf32>
    %111 = vector.broadcast %110 : vector<2x8x1xf32> to vector<2x8x8xf32>
    %112 = arith.mulf %107, %111 : vector<2x8x8xf32>
    %113 = arith.truncf %112 : vector<2x8x8xf32> to vector<2x8x8xbf16>
    "tpu.trace_start"() <{level = 10 : i32, message = "bqk,bkd->bqd"}> : () -> ()
    %cst_33 = arith.constant dense<0.000000e+00> : vector<2x8x8xf32>
    %114 = tpu.matmul %113, %97, %cst_33 {dimension_numbers = #tpu.dot_dimension_numbers<[2], [1], [1], [2], [0, 0, 0, 1, 1, 2], [0], [0]>} : vector<2x8x8xbf16>, vector<2x8x8xbf16>, vector<2x8x8xf32> -> vector<2x8x8xf32>
    "tpu.trace_stop"() : () -> ()
    %115 = vector.shape_cast %114 : vector<2x8x8xf32> to vector<16x8xf32>
    %116 = arith.truncf %115 : vector<16x8xf32> to vector<16x8xbf16>
    %c3 = arith.constant 3 : index
    %c0_34 = arith.constant 0 : index
    %c0_35 = arith.constant 0 : index
    %117 = vector.load %arg2[%c3, %c0_34, %c0_35] : memref<4x8x32xbf16, #tpu.memory_space<vmem>>, vector<1x8x32xbf16>
    %118 = vector.shape_cast %117 : vector<1x8x32xbf16> to vector<8x32xbf16>
    %cst_36 = arith.constant dense<0.000000e+00> : vector<16x32xf32>
    %119 = tpu.matmul %116, %118, %cst_36 {dimension_numbers = #tpu.dot_dimension_numbers<[1], [0], [0], [1], [0, 0, 1, 1], [], []>} : vector<16x8xbf16>, vector<8x32xbf16>, vector<16x32xf32> -> vector<16x32xf32>
    %120 = arith.addf %94, %119 : vector<16x32xf32>
    %c0_37 = arith.constant 0 : index
    %c0_38 = arith.constant 0 : index
    %121 = vector.load %arg3[%c0_37, %c0_38] : memref<1x32xf32, #tpu.memory_space<vmem>>, vector<1x32xf32>
    %122 = vector.broadcast %121 : vector<1x32xf32> to vector<16x32xf32>
    %123 = arith.addf %120, %122 : vector<16x32xf32>
    %c0_39 = arith.constant 0 : index
    %c0_40 = arith.constant 0 : index
    %124 = vector.load %arg4[%c0_39, %c0_40] : memref<16x32xf32, #tpu.memory_space<vmem>>, vector<16x32xf32>
    tpu.vector_store %arg4[%c0_39, %c0_40], %123 {strides = array<i32>} : memref<16x32xf32, #tpu.memory_space<vmem>>, vector<16x32xf32>,
    return
  }
}

</mosaic_0001>

<bundles_post_ra>
// kernel: multi_head_attention.1
= control target key start
LH: loop header
LB: loop body
LE: loop exit
PB: predicated region body
PF: predicated region fallthrough
CT: control target
= control target key end

     0   :  { %9 = vsyncpa [#allocation3], 0  ;;  %s1789_s0 = inlined_call_operand.vmem [shape: bf16[16,32], index: 0, kind: input, shape index: {}]   ;;  %s1790_s1 = inlined_call_operand.vmem [shape: bf16[32,96], index: 1, kind: input, shape index: {}]   ;;  %s1791_s2 = inlined_call_operand.hbm [shape: bf16[4,8,32], index: 2, kind: input, shape index: {}]   ;;  %s1792_s3 = inlined_call_operand.vmem [shape: f32[1,32], index: 3, kind: input, shape index: {}]   ;;  %s1793_s4 = inlined_call_operand.hbm [shape: f32[16,32], index: 4, kind: output, shape index: {}]  }
   0x1   :  { %10 = vsyncpa [#allocation4], 0  ;;  %s1528_s15 = smov [#allocation2]  }
   0x2   :  { %s20_s16 = sshll.u32 %s1528_s15, 4  ;;  %s21_s16 = int_to_ptr.vmem [resolvable:$true] %s20_s16 }
   0x3   :  { %s1492_s17 = scalar_lea.vmem %s21_s16, 256  ;;  %p1497_p1 = scmp.lt.s32.totalorder %s21_s16, %s21_s16 }
   0x4   :  { %p1493_p0 = scmp.ne.s32.totalorder %s21_s16, %s1492_s17  ;;  %p1498_p2 = scmp.lt.s32.totalorder %s1492_s17, %s1492_s17 }
   0x6   :  { %p1499_p3 = por %p1498_p2, %p1497_p1 }
   0x8   :  { %p1500_p4 = pnand %p1499_p3, %p1493_p0 }
   0xa   :  { %1503 = shalt.err (!%p1500_p4)
}
   0xb   :  { %s1529_s18 = smov 64   ;;  %s1530_s19 = smov 4  }
   0xc   :  { %26 = dma.hbm_to_vmem [thread:$0]  %s1791_s2, 256, %s21_s16, [#allocation3], %s1529_s18, %s1529_s18, %s1530_s19  }
   0xd   :  { %1524 = dma.done.wait [#allocation3], 256  }
   0xe   :  { %1525 = vsyncadd [#allocation3], 4294967040  ;;  %v1531_v0 = vmov 0.0   ;;  %vm1532_vm0 = vmmov 0   ;;  %v1449_v1 = vld [vmem:[%s1790_s1 + $0x8] sm:$0xff]   ;;  %v1450_v2 = vld [vmem:[%s1790_s1] sm:$0xff]   ;;  %v107_v14 = vlaneseq }
   0xf   :  { %1303 = vmatprep.subr.bf16.mxu0 %v1531_v0  ;;  %1307 = vmatprep.mubr.msk.bf16.mxu0 %vm1532_vm0, %v1531_v0  ;;  %v1451_v3 = vld [vmem:[%s1789_s0] sm:$0xff]   ;;  %vm56_vm1 = vcmask 261120   ;;  %s1533_s1 = smov 96   ;;  %vm114_vm2 = vcmask 64512   ;;  %s1534_s0 = smov 88   ;;  %vm242_vm4 = vcmask 1043456  }
  0x10   :  { %1311 = vmatprep.subr.bf16.mxu1 %v1531_v0  ;;  %1313 = vmatprep.mubr.msk.bf16.mxu1 %vm1532_vm0, %v1531_v0  ;;  %v108_v15 = vshrl.u32 %v107_v14, 7  ;;  %v110_v16 = vand.u32 127, %v107_v14  ;;  %s1535_s27 = smov 120   ;;  %s1536_s28 = smov 56  }
  0x11   :  { %1304 = vmatpush3.bf16.msra.mxu0 %v1449_v1  ;;  %s1537_s29 = smov 112   ;;  %s1538_s30 = smov 80  }
  0x12   :  { %1305 = vmatprep.subr.bf16.mxu0 %v1531_v0  ;;  %vm1614_vm3 = vcmp.le.s32.totalorder %v110_v16, %v108_v15  ;;  %s1539_s5 = smov 48   ;;  %s1540_s6 = smov 72  }
  0x13   :  { %s1541_s7 = smov 104   ;;  %s1542_s8 = smov 40  }
  0x14   :  { %s1543_s11 = smov [#allocation5]  }
  0x15   :  { %1306 = vmatpush3.bf16.msra.mxu0 %v1450_v2  ;;  %s1219_s12 = sshll.u32 %s1543_s11, 4  ;;  %s1220_s12 = int_to_ptr.vmem [resolvable:$true] %s1219_s12 }
  0x16   :  { %1317 = vmatprep.subr.bf16.mxu0 %v1531_v0  ;;  %s1504_s13 = scalar_lea.vmem %s1220_s12, 256  ;;  %p1509_p6 = scmp.lt.s32.totalorder %s1220_s12, %s1220_s12 }
  0x17   :  { %p1505_p5 = scmp.ne.s32.totalorder %s1220_s12, %s1504_s13  ;;  %p1510_p7 = scmp.lt.s32.totalorder %s1504_s13, %s1504_s13 }
  0x18   :  { %1308 = vmatmul.mubr.msk.bf16.vlgmr.msra.gmra.mxu0 %vm56_vm1, %v1451_v3 }
  0x19   :  { %1319 = vmatprep.mubr.msk.bf16.mxu0 %vm1532_vm0, %v1531_v0  ;;  %p1511_p8 = por %p1510_p7, %p1509_p6 }
  0x1b   :  { %p1512_p9 = pnand %p1511_p8, %p1505_p5 }
  0xd8   :  { %v94_v4 = vpop.f32.mrf.mxu0 }
  0xd9   :  { %v1596_v5 = vpack.c.bf16 %v94_v4, %v94_v4 }
  0xda   :  { %v1309_v6 = vpop.f32.mrf.mxu0 }
  0xdb   :  { %112 = vrot.lane.b32.xlu0 %v1596_v5, %s1533_s1 }
  0xdc   :  { %v97_v7 = vpop.f32.mrf.mxu0 }
  0xdd   :  { %v1599_v8 = vpack.c.bf16 %v97_v7, %v97_v7 }
  0xde   :  { %v1310_v9 = vpop.f32.mrf.mxu0 }
  0xdf   :  { %161 = vrot.lane.b32.xlu0 %v1599_v8, %s1533_s1 }
 0x14d   :  { %v113_v10 = vpop.permute.xlu0 %112 }
 0x14e   :  { %v119_v11 = vsel %vm114_vm2, %v113_v10, 0 }
 0x14f   :  { %1312 = vmatpush3.bf16.xpose.msra.mxu1 %v119_v11 }
 0x150   :  { %1323 = vmatprep.subr.bf16.mxu1 %v1531_v0 }
 0x151   :  { %v162_v12 = vpop.permute.xlu0 %161 }
 0x152   :  { %v167_v13 = vsel %vm114_vm2, %v162_v12, 0 }
 0x153   :  { %1318 = vmatpush3.bf16.xpose.msra.mxu0 %v167_v13 }
 0x154   :  { %1329 = vmatprep.subr.bf16.mxu0 %v1531_v0 }
 0x156   :  { %1314 = vmatmul.mubr.msk.bf16.vlgmr.msra.gmra.mxu1 %vm114_vm2, %v1596_v5 }
 0x157   :  { %1325 = vmatprep.mubr.msk.bf16.mxu1 %vm1532_vm0, %v1531_v0 }
 0x15a   :  { %1320 = vmatmul.mubr.msk.bf16.vlgmr.msra.gmra.mxu0 %vm114_vm2, %v1599_v8 }
 0x15b   :  { %1331 = vmatprep.mubr.msk.bf16.mxu0 %vm1532_vm0, %v1531_v0 }
 0x216   :  { %v155_v18 = vpop.f32.mrf.mxu1 }
 0x217   :  { %v211_v19 = vsel %vm1614_vm3, %v155_v18, -inf }
 0x218   :  { %v1315_v20 = vpop.f32.mrf.mxu1  ;;  %v213_v21 = vsel %vm114_vm2, %v211_v19, -inf }
 0x219   :  { %214 = vmax.xlane.f32.xlu1 %v213_v21 }
 0x21a   :  { %v158_v22 = vpop.f32.mrf.mxu1  ;;  %v203_v23 = vpop.f32.mrf.mxu0 }
 0x21b   :  { %v212_v24 = vsel %vm1614_vm3, %v203_v23, -inf }
 0x21c   :  { %v1316_v25 = vpop.f32.mrf.mxu1  ;;  %v1321_v26 = vpop.f32.mrf.mxu0  ;;  %v216_v27 = vsel %vm114_vm2, %v212_v24, -inf }
 0x21d   :  { %217 = vmax.xlane.f32.xlu1 %v216_v27 }
 0x21e   :  { %v206_v28 = vpop.f32.mrf.mxu0 }
 0x220   :  { %v1322_v29 = vpop.f32.mrf.mxu0 }
 0x22e   :  { %237 = vrot.lane.b32.xlu1 %v1596_v5, %s1529_s18 }
 0x232   :  { %286 = vrot.lane.b32.xlu1 %v1599_v8, %s1529_s18 }
 0x236   :  { %338 = vrot.lane.b32.xlu1 %v1596_v5, %s1534_s0 }
 0x2a2   :  { %v215_v30 = vpop.xlane.xlu1 %214 }
 0x2a3   :  { %v219_v31 = vsub.f32 %v211_v19, %v215_v30 }
 0x2a5   :  { %v221_v32 = vmul.f32 1.442695, %v219_v31 }
 0x2a6   :  { %v218_v33 = vpop.xlane.xlu1 %217 }
 0x2a7   :  { %1452 = vpow2.f32 %v221_v32  ;;  %v220_v34 = vsub.f32 %v212_v24, %v218_v33 }
 0x2a9   :  { %v223_v35 = vmul.f32 1.442695, %v220_v34 }
 0x2aa   :  { %v238_v36 = vpop.permute.xlu1 %237 }
 0x2ab   :  { %1454 = vpow2.f32 %v223_v35  ;;  %v244_v37 = vsel %vm242_vm4, %v238_v36, 0 }
 0x2ac   :  { %1324 = vmatpush3.bf16.msra.mxu1 %v244_v37 }
 0x2ad   :  { %1335 = vmatprep.subr.bf16.mxu1 %v1531_v0 }
 0x2ae   :  { %v287_v38 = vpop.permute.xlu1 %286 }
 0x2af   :  { %v292_v39 = vsel %vm242_vm4, %v287_v38, 0 }
 0x2b0   :  { %1330 = vmatpush3.bf16.msra.mxu0 %v292_v39  ;;  %v335_v39 = vld [vmem:[#allocation2] sm:$0xf] }
 0x2b1   :  { %1341 = vmatprep.subr.bf16.mxu0 %v1531_v0 }
 0x2b2   :  { %v339_v44 = vpop.permute.xlu1 %338 }
 0x2b3   :  { %v344_v51 = vsel %vm114_vm2, %v339_v44, 0 }
 0x2b4   :  { %v1453_v40 = vpop.eup %1452 }
 0x2b5   :  { %v225_v41 = vsel %vm114_vm2, %v1453_v40, 0.0 }
 0x2b6   :  { %226 = vadd.xlane.f32.xlu0 %v225_v41 }
 0x2b8   :  { %v1455_v42 = vpop.eup %1454 }
 0x2b9   :  { %v228_v43 = vsel %vm114_vm2, %v1455_v42, 0.0 }
 0x2ba   :  { %229 = vadd.xlane.f32.xlu1 %v228_v43 }
 0x2cb   :  { %388 = vrot.lane.b32.xlu1 %v1599_v8, %s1534_s0 }
 0x2cc   :  { %336 = vrot.lane.b32.xlu0 %v1596_v5, %s1535_s27 }
 0x2cf   :  { %386 = vrot.lane.b32.xlu1 %v1599_v8, %s1535_s27 }
 0x33f   :  { %v227_v45 = vpop.xlane.xlu0 %226 }
 0x340   :  { %1456 = vrcp.f32 %v227_v45 }
 0x343   :  { %v230_v46 = vpop.xlane.xlu1 %229  ;;  %v337_v56 = vpop.permute.xlu0 %336 }
 0x344   :  { %1458 = vrcp.f32 %v230_v46 }
 0x347   :  { %v389_v53 = vpop.permute.xlu1 %388 }
 0x348   :  { %v394_v55 = vsel %vm114_vm2, %v389_v53, 0 }
 0x34b   :  { %v387_v57 = vpop.permute.xlu1 %386 }
 0x34d   :  { %v1457_v47 = vpop.eup %1456 }
 0x34e   :  { %v233_v48 = vmul.f32 %v1457_v47, %v1453_v40  ;;  %v560_v47 = vld [vmem:[#allocation2 + $0x4] sm:$0xf] }
 0x350   :  { %v235_v49 = vpack.c.bf16 %v233_v48, %v233_v48  ;;  %v565_v48 = vsel %vm242_vm4, %v560_v47, 0 }
 0x351   :  { %v1459_v50 = vpop.eup %1458 }
 0x352   :  { %1326 = vmatmul.mubr.msk.bf16.vlgmr.msra.gmra.mxu1 %vm114_vm2, %v235_v49  ;;  %v234_v52 = vmul.f32 %v1459_v50, %v1455_v42  ;;  %v612_v42 = vsel %vm242_vm4, %v335_v39, 0 }
 0x353   :  { %1336 = vmatpush3.bf16.xpose.msra.mxu1 %v344_v51  ;;  %1337 = vmatprep.mubr.msk.bf16.mxu1 %vm1532_vm0, %v1531_v0 }
 0x354   :  { %v236_v54 = vpack.c.bf16 %v234_v52, %v234_v52  ;;  %1347 = vmatprep.subr.bf16.mxu1 %v1531_v0 }
 0x356   :  { %1332 = vmatmul.mubr.msk.bf16.vlgmr.msra.gmra.mxu0 %vm114_vm2, %v236_v54 }
 0x357   :  { %1342 = vmatpush3.bf16.xpose.msra.mxu0 %v394_v55  ;;  %1343 = vmatprep.mubr.msk.bf16.mxu0 %vm1532_vm0, %v1531_v0 }
 0x358   :  { %1353 = vmatprep.subr.bf16.mxu0 %v1531_v0 }
 0x35a   :  { %1338 = vmatmul.mubr.msk.bf16.vlgmr.msra.gmra.mxu1 %vm114_vm2, %v337_v56 }
 0x35b   :  { %1349 = vmatprep.mubr.msk.bf16.mxu1 %vm1532_vm0, %v1531_v0 }
 0x35e   :  { %1344 = vmatmul.mubr.msk.bf16.vlgmr.msra.gmra.mxu0 %vm114_vm2, %v387_v57 }
 0x35f   :  { %1355 = vmatprep.mubr.msk.bf16.mxu0 %vm1532_vm0, %v1531_v0 }
 0x412   :  { %v1654_v58 = vpop.f32.mrf.mxu1 }
 0x414   :  { %v1327_v59 = vpop.f32.mrf.mxu1 }
 0x416   :  { %v283_v60 = vpop.f32.mrf.mxu1  ;;  %v1656_v61 = vpop.f32.mrf.mxu0 }
 0x417   :  { %v334_v62 = vpack.c.bf16 %v1656_v61, %v1654_v58 }
 0x418   :  { %v1328_v63 = vpop.f32.mrf.mxu1  ;;  %v1333_v1 = vpop.f32.mrf.mxu0 }
 0x41a   :  { %v331_v2 = vpop.f32.mrf.mxu0  ;;  %v380_v3 = vpop.f32.mrf.mxu1 }
 0x41b   :  { %v436_v4 = vsel %vm1614_vm3, %v380_v3, -inf }
 0x41c   :  { %v1334_v6 = vpop.f32.mrf.mxu0  ;;  %v1339_v7 = vpop.f32.mrf.mxu1  ;;  %v438_v9 = vsel %vm114_vm2, %v436_v4, -inf }
 0x41d   :  { %439 = vmax.xlane.f32.xlu1 %v438_v9 }
 0x41e   :  { %v383_v10 = vpop.f32.mrf.mxu1  ;;  %v430_v11 = vpop.f32.mrf.mxu0 }
 0x41f   :  { %v437_v12 = vsel %vm1614_vm3, %v430_v11, -inf }
 0x420   :  { %v1340_v13 = vpop.f32.mrf.mxu1  ;;  %v1345_v14 = vpop.f32.mrf.mxu0  ;;  %v441_v15 = vsel %vm114_vm2, %v437_v12, -inf }
 0x421   :  { %442 = vmax.xlane.f32.xlu0 %v441_v15 }
 0x422   :  { %v433_v16 = vpop.f32.mrf.mxu0 }
 0x424   :  { %v1346_v18 = vpop.f32.mrf.mxu0 }
 0x437   :  { %510 = vrot.lane.b32.xlu0 %v1599_v8, %s1536_s28 }
 0x43b   :  { %655 = vrot.lane.b32.xlu0 %v1596_v5, %s1537_s29 }
 0x4a6   :  { %v440_v19 = vpop.xlane.xlu1 %439 }
 0x4a7   :  { %v444_v20 = vsub.f32 %v436_v4, %v440_v19 }
 0x4a9   :  { %v446_v21 = vmul.f32 1.442695, %v444_v20 }
 0x4aa   :  { %v443_v22 = vpop.xlane.xlu0 %442 }
 0x4ab   :  { %1460 = vpow2.f32 %v446_v21  ;;  %v445_v23 = vsub.f32 %v437_v12, %v443_v22 }
 0x4ad   :  { %v448_v24 = vmul.f32 1.442695, %v445_v23 }
 0x4ae   :  { %v511_v25 = vpop.permute.xlu0 %510 }
 0x4af   :  { %1462 = vpow2.f32 %v448_v24  ;;  %v516_v26 = vsel %vm242_vm4, %v511_v25, 0 }
 0x4b0   :  { %1354 = vmatpush3.bf16.msra.mxu0 %v516_v26 }
 0x4b1   :  { %1365 = vmatprep.subr.bf16.mxu0 %v1531_v0 }
 0x4b2   :  { %v656_v60 = vpop.permute.xlu0 %655 }
 0x4b8   :  { %v1461_v27 = vpop.eup %1460 }
 0x4b9   :  { %v450_v28 = vsel %vm114_vm2, %v1461_v27, 0.0 }
 0x4ba   :  { %451 = vadd.xlane.f32.xlu1 %v450_v28 }
 0x4bc   :  { %v1463_v29 = vpop.eup %1462 }
 0x4bd   :  { %v453_v30 = vsel %vm114_vm2, %v1463_v29, 0.0 }
 0x4be   :  { %454 = vadd.xlane.f32.xlu1 %v453_v30 }
 0x4cf   :  { %462 = vrot.lane.b32.xlu1 %v1596_v5, %s1536_s28 }
 0x4d3   :  { %657 = vrot.lane.b32.xlu1 %v1596_v5, %s1538_s30 }
 0x4d7   :  { %707 = vrot.lane.b32.xlu1 %v1599_v8, %s1538_s30 }
 0x4db   :  { %705 = vrot.lane.b32.xlu1 %v1599_v8, %s1537_s29 }
 0x543   :  { %v452_v31 = vpop.xlane.xlu1 %451 }
 0x544   :  { %1464 = vrcp.f32 %v452_v31 }
 0x547   :  { %v455_v32 = vpop.xlane.xlu1 %454 }
 0x548   :  { %1466 = vrcp.f32 %v455_v32 }
 0x54b   :  { %v463_v33 = vpop.permute.xlu1 %462 }
 0x54c   :  { %v468_v34 = vsel %vm242_vm4, %v463_v33, 0 }
 0x54d   :  { %1348 = vmatpush3.bf16.msra.mxu1 %v468_v34 }
 0x54e   :  { %1359 = vmatprep.subr.bf16.mxu1 %v1531_v0 }
 0x54f   :  { %v658_v43 = vpop.permute.xlu1 %657 }
 0x550   :  { %v663_v56 = vsel %vm114_vm2, %v658_v43, 0 }
 0x551   :  { %v1465_v35 = vpop.eup %1464 }
 0x552   :  { %v458_v36 = vmul.f32 %v1465_v35, %v1461_v27 }
 0x553   :  { %v708_v44 = vpop.permute.xlu1 %707 }
 0x554   :  { %v460_v37 = vpack.c.bf16 %v458_v36, %v458_v36  ;;  %v713_v45 = vsel %vm114_vm2, %v708_v44, 0 }
 0x555   :  { %v1467_v38 = vpop.eup %1466 }
 0x556   :  { %1350 = vmatmul.mubr.msk.bf16.vlgmr.msra.gmra.mxu1 %vm114_vm2, %v460_v37  ;;  %v459_v40 = vmul.f32 %v1467_v38, %v1463_v29 }
 0x557   :  { %1361 = vmatprep.mubr.msk.bf16.mxu1 %vm1532_vm0, %v1531_v0  ;;  %v706_v46 = vpop.permute.xlu1 %705  ;;  %1360 = vmatpush3.bf16.msra.mxu1 %v565_v48 }
 0x558   :  { %v461_v41 = vpack.c.bf16 %v459_v40, %v459_v40  ;;  %1371 = vmatprep.subr.bf16.mxu1 %v1531_v0 }
 0x55a   :  { %1356 = vmatmul.mubr.msk.bf16.vlgmr.msra.gmra.mxu0 %vm114_vm2, %v461_v41 }
 0x55b   :  { %1366 = vmatpush3.bf16.msra.mxu0 %v612_v42  ;;  %1367 = vmatprep.mubr.msk.bf16.mxu0 %vm1532_vm0, %v1531_v0 }
 0x55c   :  { %1377 = vmatprep.subr.bf16.mxu0 %v1531_v0 }
 0x562   :  { %1368 = vmatmul.mubr.msk.bf16.vlgmr.msra.gmra.mxu0 %vm114_vm2, %v334_v62 }
 0x563   :  { %1378 = vmatpush3.bf16.xpose.msra.mxu0 %v713_v45  ;;  %1379 = vmatprep.mubr.msk.bf16.mxu0 %vm1532_vm0, %v1531_v0  ;;  %v879_v45 = vld [vmem:[#allocation2 + $0x8] sm:$0xf] }
 0x564   :  { %1389 = vmatprep.subr.bf16.mxu0 %v1531_v0 }
 0x56a   :  { %1380 = vmatmul.mubr.msk.bf16.vlgmr.msra.gmra.mxu0 %vm114_vm2, %v706_v46  ;;  %v884_v46 = vsel %vm242_vm4, %v879_v45, 0 }
 0x56b   :  { %1391 = vmatprep.mubr.msk.bf16.mxu0 %vm1532_vm0, %v1531_v0 }
 0x616   :  { %v504_v49 = vpop.f32.mrf.mxu1 }
 0x618   :  { %v1351_v50 = vpop.f32.mrf.mxu1 }
 0x61a   :  { %v507_v51 = vpop.f32.mrf.mxu1  ;;  %v552_v52 = vpop.f32.mrf.mxu0 }
 0x61b   :  { %v558_v53 = vpack.c.bf16 %v552_v52, %v504_v49 }
 0x61c   :  { %v1352_v54 = vpop.f32.mrf.mxu1  ;;  %v1357_v55 = vpop.f32.mrf.mxu0 }
 0x61d   :  { %1362 = vmatmul.mubr.msk.bf16.vlgmr.msra.gmra.mxu1 %vm114_vm2, %v558_v53 }
 0x61e   :  { %1372 = vmatpush3.bf16.xpose.msra.mxu1 %v663_v56  ;;  %v555_v57 = vpop.f32.mrf.mxu0  ;;  %1373 = vmatprep.mubr.msk.bf16.mxu1 %vm1532_vm0, %v1531_v0 }
 0x61f   :  { %1383 = vmatprep.subr.bf16.mxu1 %v1531_v0 }
 0x620   :  { %v1358_v58 = vpop.f32.mrf.mxu0 }
 0x622   :  { %v1704_v59 = vpop.f32.mrf.mxu0 }
 0x624   :  { %v1369_v61 = vpop.f32.mrf.mxu0 }
 0x625   :  { %1374 = vmatmul.mubr.msk.bf16.vlgmr.msra.gmra.mxu1 %vm114_vm2, %v656_v60 }
 0x626   :  { %v1707_v62 = vpop.f32.mrf.mxu0  ;;  %1385 = vmatprep.mubr.msk.bf16.mxu1 %vm1532_vm0, %v1531_v0 }
 0x628   :  { %v1370_v63 = vpop.f32.mrf.mxu0 }
 0x62a   :  { %v749_v1 = vpop.f32.mrf.mxu0 }
 0x62b   :  { %v756_v2 = vsel %vm1614_vm3, %v749_v1, -inf }
 0x62c   :  { %v1381_v3 = vpop.f32.mrf.mxu0  ;;  %v760_v4 = vsel %vm114_vm2, %v756_v2, -inf }
 0x62d   :  { %761 = vmax.xlane.f32.xlu1 %v760_v4 }
 0x62e   :  { %v752_v6 = vpop.f32.mrf.mxu0 }
 0x630   :  { %v1382_v7 = vpop.f32.mrf.mxu0 }
 0x63e   :  { %781 = vrot.lane.b32.xlu1 %v1596_v5, %s1539_s5 }
 0x642   :  { %931 = vrot.lane.b32.xlu1 %v1596_v5, %s1540_s6 }
 0x646   :  { %981 = vrot.lane.b32.xlu1 %v1599_v8, %s1540_s6 }
 0x64a   :  { %979 = vrot.lane.b32.xlu1 %v1599_v8, %s1541_s7 }
 0x6b6   :  { %v762_v9 = vpop.xlane.xlu1 %761 }
 0x6b7   :  { %v764_v12 = vsub.f32 %v756_v2, %v762_v9 }
 0x6b9   :  { %v767_v13 = vmul.f32 1.442695, %v764_v12 }
 0x6ba   :  { %v782_v10 = vpop.permute.xlu1 %781 }
 0x6bb   :  { %v787_v11 = vsel %vm242_vm4, %v782_v10, 0  ;;  %1468 = vpow2.f32 %v767_v13 }
 0x6bc   :  { %1384 = vmatpush3.bf16.msra.mxu1 %v787_v11 }
 0x6bd   :  { %1395 = vmatprep.subr.bf16.mxu1 %v1531_v0 }
 0x6be   :  { %v932_v38 = vpop.permute.xlu1 %931 }
 0x6bf   :  { %v937_v40 = vsel %vm114_vm2, %v932_v38, 0 }
 0x6c2   :  { %v982_v52 = vpop.permute.xlu1 %981 }
 0x6c3   :  { %v987_v61 = vsel %vm114_vm2, %v982_v52, 0 }
 0x6c6   :  { %v980_v3 = vpop.permute.xlu1 %979 }
 0x6c8   :  { %v1469_v23 = vpop.eup %1468 }
 0x6c9   :  { %v772_v26 = vsel %vm114_vm2, %v1469_v23, 0.0 }
 0x6dd   :  { %v1722_v14 = vpop.f32.mrf.mxu1 }
 0x6de   :  { %v649_v11 = vadd.f32 %v1704_v59, %v1722_v14 }
 0x6df   :  { %v1363_v15 = vpop.f32.mrf.mxu1 }
 0x6e1   :  { %v1724_v16 = vpop.f32.mrf.mxu1 }
 0x6e3   :  { %v1364_v18 = vpop.f32.mrf.mxu1 }
 0x6e4   :  { %v652_v18 = vadd.f32 %v1707_v62, %v1724_v16 }
 0x6e5   :  { %v699_v19 = vpop.f32.mrf.mxu1 }
 0x6e6   :  { %v755_v20 = vsel %vm1614_vm3, %v699_v19, -inf }
 0x6e7   :  { %v1375_v21 = vpop.f32.mrf.mxu1  ;;  %v757_v22 = vsel %vm114_vm2, %v755_v20, -inf }
 0x6e8   :  { %758 = vmax.xlane.f32.xlu0 %v757_v22 }
 0x6e9   :  { %v702_v24 = vpop.f32.mrf.mxu1 }
 0x6eb   :  { %v1376_v25 = vpop.f32.mrf.mxu1 }
 0x6ec   :  { %773 = vadd.xlane.f32.xlu0 %v772_v26 }
 0x771   :  { %v759_v27 = vpop.xlane.xlu0 %758 }
 0x772   :  { %v763_v28 = vsub.f32 %v755_v20, %v759_v27 }
 0x774   :  { %v765_v29 = vmul.f32 1.442695, %v763_v28 }
 0x775   :  { %v774_v32 = vpop.xlane.xlu0 %773 }
 0x776   :  { %1470 = vpow2.f32 %v765_v29 }
 0x777   :  { %1472 = vrcp.f32 %v774_v32 }
 0x783   :  { %v1471_v30 = vpop.eup %1470 }
 0x784   :  { %v769_v31 = vsel %vm114_vm2, %v1471_v30, 0.0  ;;  %v1473_v33 = vpop.eup %1472 }
 0x785   :  { %770 = vadd.xlane.f32.xlu0 %v769_v31  ;;  %v778_v35 = vmul.f32 %v1473_v33, %v1469_v23  ;;  %v1153_v33 = vld [vmem:[#allocation2 + $0xc] sm:$0xf] }
 0x787   :  { %v780_v39 = vpack.c.bf16 %v778_v35, %v778_v35 }
 0x79b   :  { %829 = vrot.lane.b32.xlu0 %v1599_v8, %s1539_s5 }
 0x79f   :  { %929 = vrot.lane.b32.xlu0 %v1596_v5, %s1541_s7 }
 0x80e   :  { %v771_v34 = vpop.xlane.xlu0 %770 }
 0x80f   :  { %1474 = vrcp.f32 %v771_v34  ;;  %v1158_v34 = vsel %vm242_vm4, %v1153_v33, 0 }
 0x812   :  { %v830_v36 = vpop.permute.xlu0 %829 }
 0x813   :  { %v835_v37 = vsel %vm242_vm4, %v830_v36, 0 }
 0x814   :  { %1390 = vmatpush3.bf16.msra.mxu0 %v835_v37 }
 0x815   :  { %1401 = vmatprep.subr.bf16.mxu0 %v1531_v0 }
 0x816   :  { %v930_v43 = vpop.permute.xlu0 %929 }
 0x817   :  { %1392 = vmatmul.mubr.msk.bf16.vlgmr.msra.gmra.mxu0 %vm114_vm2, %v780_v39 }
 0x818   :  { %1402 = vmatpush3.bf16.xpose.msra.mxu0 %v937_v40  ;;  %1403 = vmatprep.mubr.msk.bf16.mxu0 %vm1532_vm0, %v1531_v0 }
 0x819   :  { %1413 = vmatprep.subr.bf16.mxu0 %v1531_v0 }
 0x81c   :  { %v1475_v41 = vpop.eup %1474 }
 0x81d   :  { %v777_v42 = vmul.f32 %v1475_v41, %v1471_v30 }
 0x81f   :  { %1404 = vmatmul.mubr.msk.bf16.vlgmr.msra.gmra.mxu0 %vm114_vm2, %v930_v43  ;;  %v779_v44 = vpack.c.bf16 %v777_v42, %v777_v42 }
 0x820   :  { %1415 = vmatprep.mubr.msk.bf16.mxu0 %vm1532_vm0, %v1531_v0 }
 0x821   :  { %1386 = vmatmul.mubr.msk.bf16.vlgmr.msra.gmra.mxu1 %vm114_vm2, %v779_v44 }
 0x822   :  { %1397 = vmatprep.mubr.msk.bf16.mxu1 %vm1532_vm0, %v1531_v0  ;;  %1396 = vmatpush3.bf16.msra.mxu1 %v884_v46 }
 0x823   :  { %1407 = vmatprep.subr.bf16.mxu1 %v1531_v0 }
 0x8d7   :  { %v871_v47 = vpop.f32.mrf.mxu0 }
 0x8d9   :  { %v1393_v48 = vpop.f32.mrf.mxu0 }
 0x8db   :  { %v874_v49 = vpop.f32.mrf.mxu0 }
 0x8dc   :  { %v1257_v49 = vld [vmem:[%s1792_s3] ss:$0 sm:$0xff] }
 0x8dd   :  { %v1394_v50 = vpop.f32.mrf.mxu0 }
 0x8df   :  { %v973_v51 = vpop.f32.mrf.mxu0 }
 0x8e0   :  { %v1029_v53 = vsel %vm1614_vm3, %v973_v51, -inf }
 0x8e1   :  { %v823_v54 = vpop.f32.mrf.mxu1  ;;  %v1405_v55 = vpop.f32.mrf.mxu0  ;;  %v1031_v56 = vsel %vm114_vm2, %v1029_v53, -inf }
 0x8e2   :  { %v877_v57 = vpack.c.bf16 %v871_v47, %v823_v54  ;;  %1032 = vmax.xlane.f32.xlu0 %v1031_v56 }
 0x8e3   :  { %v1387_v58 = vpop.f32.mrf.mxu1  ;;  %v976_v60 = vpop.f32.mrf.mxu0 }
 0x8e4   :  { %1398 = vmatmul.mubr.msk.bf16.vlgmr.msra.gmra.mxu1 %vm114_vm2, %v877_v57 }
 0x8e5   :  { %1408 = vmatpush3.bf16.xpose.msra.mxu1 %v987_v61  ;;  %v826_v63 = vpop.f32.mrf.mxu1  ;;  %v1406_v1 = vpop.f32.mrf.mxu0  ;;  %1409 = vmatprep.mubr.msk.bf16.mxu1 %vm1532_vm0, %v1531_v0 }
 0x8e6   :  { %1419 = vmatprep.subr.bf16.mxu1 %v1531_v0 }
 0x8e7   :  { %v1388_v2 = vpop.f32.mrf.mxu1 }
 0x8ec   :  { %1410 = vmatmul.mubr.msk.bf16.vlgmr.msra.gmra.mxu1 %vm114_vm2, %v980_v3 }
 0x8ed   :  { %1421 = vmatprep.mubr.msk.bf16.mxu1 %vm1532_vm0, %v1531_v0 }
 0x96b   :  { %v1033_v4 = vpop.xlane.xlu0 %1032 }
 0x96c   :  { %v1037_v6 = vsub.f32 %v1029_v53, %v1033_v4 }
 0x96e   :  { %v1039_v7 = vmul.f32 1.442695, %v1037_v6 }
 0x970   :  { %1476 = vpow2.f32 %v1039_v7 }
 0x97d   :  { %v1477_v9 = vpop.eup %1476 }
 0x97e   :  { %v1043_v10 = vsel %vm114_vm2, %v1477_v9, 0.0 }
 0x97f   :  { %1044 = vadd.xlane.f32.xlu0 %v1043_v10 }
 0x9a4   :  { %v920_v12 = vpop.f32.mrf.mxu1 }
 0x9a5   :  { %v927_v13 = vadd.f32 %v920_v12, %v649_v11 }
 0x9a6   :  { %v1399_v15 = vpop.f32.mrf.mxu1 }
 0x9a8   :  { %v923_v19 = vpop.f32.mrf.mxu1 }
 0x9a9   :  { %v928_v20 = vadd.f32 %v923_v19, %v652_v18 }
 0x9aa   :  { %v1400_v21 = vpop.f32.mrf.mxu1 }
 0x9ac   :  { %v1023_v22 = vpop.f32.mrf.mxu1 }
 0x9ad   :  { %v1030_v23 = vsel %vm1614_vm3, %v1023_v22, -inf }
 0x9ae   :  { %v1411_v24 = vpop.f32.mrf.mxu1  ;;  %v1034_v25 = vsel %vm114_vm2, %v1030_v23, -inf }
 0x9af   :  { %1035 = vmax.xlane.f32.xlu1 %v1034_v25 }
 0x9b0   :  { %v1026_v26 = vpop.f32.mrf.mxu1 }
 0x9b2   :  { %v1412_v27 = vpop.f32.mrf.mxu1 }
 0x9c0   :  { %1055 = vrot.lane.b32.xlu1 %v1596_v5, %s1542_s8 }
 0xa08   :  { %v1045_v59 = vpop.xlane.xlu0 %1044 }
 0xa09   :  { %1478 = vrcp.f32 %v1045_v59 }
 0xa16   :  { %v1479_v14 = vpop.eup %1478 }
 0xa17   :  { %v1051_v29 = vmul.f32 %v1479_v14, %v1477_v9 }
 0xa19   :  { %v1053_v31 = vpack.c.bf16 %v1051_v29, %v1051_v29 }
 0xa38   :  { %v1036_v62 = vpop.xlane.xlu1 %1035 }
 0xa39   :  { %v1038_v16 = vsub.f32 %v1030_v23, %v1036_v62 }
 0xa3b   :  { %v1041_v28 = vmul.f32 1.442695, %v1038_v16 }
 0xa3c   :  { %v1056_v30 = vpop.permute.xlu1 %1055 }
 0xa3d   :  { %1480 = vpow2.f32 %v1041_v28  ;;  %v1061_v17 = vsel %vm242_vm4, %v1056_v30, 0 }
 0xa3e   :  { %1414 = vmatpush3.bf16.msra.mxu0 %v1061_v17 }
 0xa3f   :  { %1425 = vmatprep.subr.bf16.mxu0 %v1531_v0 }
 0xa41   :  { %1416 = vmatmul.mubr.msk.bf16.vlgmr.msra.gmra.mxu0 %vm114_vm2, %v1053_v31 }
 0xa42   :  { %1427 = vmatprep.mubr.msk.bf16.mxu0 %vm1532_vm0, %v1531_v0  ;;  %1426 = vmatpush3.bf16.msra.mxu0 %v1158_v34 }
 0xa4a   :  { %v1481_v5 = vpop.eup %1480 }
 0xa4b   :  { %v1046_v32 = vsel %vm114_vm2, %v1481_v5, 0.0 }
 0xa4c   :  { %1047 = vadd.xlane.f32.xlu0 %v1046_v32 }
 0xa62   :  { %1103 = vrot.lane.b32.xlu0 %v1599_v8, %s1542_s8 }
 0xad5   :  { %v1048_v35 = vpop.xlane.xlu0 %1047 }
 0xad6   :  { %1482 = vrcp.f32 %v1048_v35 }
 0xad9   :  { %v1104_v36 = vpop.permute.xlu0 %1103 }
 0xada   :  { %v1109_v37 = vsel %vm242_vm4, %v1104_v36, 0 }
 0xadb   :  { %1420 = vmatpush3.bf16.msra.mxu1 %v1109_v37 }
 0xae3   :  { %v1483_v38 = vpop.eup %1482 }
 0xae4   :  { %v1052_v39 = vmul.f32 %v1483_v38, %v1481_v5 }
 0xae6   :  { %v1054_v40 = vpack.c.bf16 %v1052_v39, %v1052_v39 }
 0xae8   :  { %1422 = vmatmul.mubr.msk.bf16.vlgmr.msra.gmra.mxu1 %vm114_vm2, %v1054_v40 }
 0xb01   :  { %v1097_v0 = vpop.f32.mrf.mxu0 }
 0xb03   :  { %v1417_v41 = vpop.f32.mrf.mxu0 }
 0xb05   :  { %v1100_v42 = vpop.f32.mrf.mxu0 }
 0xb07   :  { %v1418_v43 = vpop.f32.mrf.mxu0 }
 0xba8   :  { %v1145_v8 = vpop.f32.mrf.mxu1 }
 0xba9   :  { %v1151_v44 = vpack.c.bf16 %v1145_v8, %v1097_v0 }
 0xbaa   :  { %v1423_v45 = vpop.f32.mrf.mxu1 }
 0xbab   :  { %1428 = vmatmul.mubr.msk.bf16.vlgmr.msra.gmra.mxu0 %vm114_vm2, %v1151_v44 }
 0xbac   :  { %v1148_v46 = vpop.f32.mrf.mxu1 }
 0xbae   :  { %v1424_v47 = vpop.f32.mrf.mxu1 }
 0xc6b   :  { %v1194_v48 = vpop.f32.mrf.mxu0 }
 0xc6c   :  { %v1201_v50 = vadd.f32 %v1194_v48, %v927_v13 }
 0xc6d   :  { %v1429_v51 = vpop.f32.mrf.mxu0 }
 0xc6e   :  { %v1210_v52 = vadd.f32 %v1257_v49, %v1201_v50 }
 0xc6f   :  { %v1197_v53 = vpop.f32.mrf.mxu0 }
 0xc70   :  { %1212 = vst.msk [vmem:[#allocation5] sm:$0xff] %vm56_vm1, %v1210_v52  ;;  %v1202_v54 = vadd.f32 %v1197_v53, %v928_v20 }
 0xc71   :  { %v1430_v55 = vpop.f32.mrf.mxu0 }
 0xc72   :  { %v1211_v56 = vadd.f32 %v1257_v49, %v1202_v54 }
 0xc74   :  { %1213 = vst.msk [vmem:[#allocation5 + $0x8] sm:$0xff] %vm56_vm1, %v1211_v56 }
 0xc75   :  { %1515 = shalt.err (!%p1512_p9)
}
 0xc76   :  { %s1544_s3 = smov 128   ;;  %s1545_s14 = smov 8  }
 0xc77   :  { %1225 = dma.vmem_to_hbm [thread:$0]  %s1220_s12, 256, %s1793_s4, [#allocation4], %s1544_s3, %s1544_s3, %s1545_s14  }
 0xc78   :  { %1526 = dma.done.wait [#allocation4], 256  }
 0xc79   :  { %1527 = vsyncadd [#allocation4], 4294967040 }
 0xc7a   :  { %1229 = vsyncpa [#allocation3], 1 }
 0xc7b   :  { %1230 = vsyncpa [#allocation4], 1 }

</bundles_post_ra>
